<compile_context>
chip_gen: v6e
topology: v6e:2x2x1
jax: 0.10.0
libtpu: 0.0.40
codegen_flags: <defaults>
</compile_context>

<pallas_src>
import functools
import math

import jax
import jax.numpy as jnp
from jax.experimental import pallas as pl
from jax.experimental.pallas import tpu as pltpu


def _gelu_tanh(x):
    # PyTorch "gelu_pytorch_tanh" (the activation SigLIP configs use).
    # TODO(synk): only gelu_pytorch_tanh is implemented (SigLIP default); other
    # ACT2FN choices would need a different activation expression here.
    c = math.sqrt(2.0 / math.pi)
    return 0.5 * x * (1.0 + jnp.tanh(c * (x + 0.044715 * x * x * x)))


def _round_up(n, m):
    return ((n + m - 1) // m) * m


def _tpu_vmem_capacity_bytes():
    try:
        return int(pltpu.get_tpu_info().vmem_capacity_bytes)
    except Exception:
        return 64 * 1024 * 1024  # conservative fallback: v7x per-TC VMEM


# --------------------------- kernels ---------------------------------------

def _mlp_resident_kernel(x_ref, w1_ref, b1_ref, w2_ref, b2_ref, o_ref):
    # x_ref: (tm, H); w1_ref: (H, I); b1_ref: (1, I); w2_ref: (I, H); b2_ref: (1, H)
    h = jnp.dot(x_ref[...], w1_ref[...], preferred_element_type=jnp.float32)
    h = h + b1_ref[...].astype(jnp.float32)            # broadcast (1, I)
    h = _gelu_tanh(h).astype(w2_ref.dtype)             # f32 GELU, fused cast
    y = jnp.dot(h, w2_ref[...], preferred_element_type=jnp.float32)
    o_ref[...] = (y + b2_ref[...].astype(jnp.float32)).astype(o_ref.dtype)


def _mlp_itiled_kernel(x_ref, w1_ref, b1_ref, w2_ref, b2_ref, o_ref, acc_ref):
    # Grid: (row tile i, intermediate tile k).  acc_ref: (tm, H) f32 scratch.
    k = pl.program_id(1)

    @pl.when(k == 0)
    def _():
        acc_ref[...] = jnp.zeros_like(acc_ref)

    h = jnp.dot(x_ref[...], w1_ref[...], preferred_element_type=jnp.float32)
    h = h + b1_ref[...].astype(jnp.float32)
    h = _gelu_tanh(h).astype(w2_ref.dtype)
    acc_ref[...] += jnp.dot(h, w2_ref[...], preferred_element_type=jnp.float32)

    @pl.when(k == pl.num_programs(1) - 1)
    def _():
        o_ref[...] = (acc_ref[...] + b2_ref[...].astype(jnp.float32)).astype(o_ref.dtype)


# --------------------------- implementation ---------------------------------

@functools.partial(
    jax.jit,
    static_argnames=("tm", "ti", "use_itiled", "single_buffer", "vmem_limit"))
def _siglip_mlp_impl(x, w1, b1, w2, b2, *, tm, ti, use_itiled, single_buffer,
                     vmem_limit):
    B, S, H = x.shape
    I = w1.shape[1]
    M = B * S

    x2 = x.reshape(M, H)
    b1_2 = b1.reshape(1, I)
    b2_2 = b2.reshape(1, H)

    n_row = pl.cdiv(M, tm)

    cost = pl.CostEstimate(
        flops=int(4 * M * H * I),
        transcendentals=int(M * I),
        bytes_accessed=int(x2.size * x2.dtype.itemsize
                           + w1.size * w1.dtype.itemsize
                           + w2.size * w2.dtype.itemsize
                           + b1.size * b1.dtype.itemsize
                           + b2.size * b2.dtype.itemsize
                           + M * H * x.dtype.itemsize),
    )

    def const_spec(shape, index_map):
        # Block identical on every grid step -> single-buffer if supported.
        if single_buffer:
            return pl.BlockSpec(shape, index_map, pipeline_mode=pl.Buffered(1))
        return pl.BlockSpec(shape, index_map)

    if not use_itiled:
        grid = (n_row,)
        in_specs = [
            pl.BlockSpec((tm, H), lambda i: (i, 0)),        # x row tile
            const_spec((H, I), lambda i: (0, 0)),           # W1 resident
            const_spec((1, I), lambda i: (0, 0)),           # b1
            const_spec((I, H), lambda i: (0, 0)),           # W2 resident
            const_spec((1, H), lambda i: (0, 0)),           # b2
        ]
        out_specs = pl.BlockSpec((tm, H), lambda i: (i, 0))
        scratch = []
        kernel = _mlp_resident_kernel
        dims = ("parallel",)
    else:
        # Zero-pad the intermediate dim of the weights (only!) so it divides
        # the I tile.  gelu(0 @ x + 0) = 0 and 0 @ W2_pad = 0 -> exact.
        I_pad = _round_up(I, ti)
        if I_pad != I:
            w1 = jnp.pad(w1, ((0, 0), (0, I_pad - I)))
            b1_2 = jnp.pad(b1_2, ((0, 0), (0, I_pad - I)))
            w2 = jnp.pad(w2, ((0, I_pad - I), (0, 0)))
        grid = (n_row, I_pad // ti)
        in_specs = [
            pl.BlockSpec((tm, H), lambda i, k: (i, 0)),     # x row tile (reused over k)
            pl.BlockSpec((H, ti), lambda i, k: (0, k)),     # W1 streamed over I
            pl.BlockSpec((1, ti), lambda i, k: (0, k)),     # b1 slice
            pl.BlockSpec((ti, H), lambda i, k: (k, 0)),     # W2 streamed over I
            pl.BlockSpec((1, H), lambda i, k: (0, 0)),      # b2 (tiny, constant)
        ]
        out_specs = pl.BlockSpec((tm, H), lambda i, k: (i, 0))
        scratch = [pltpu.VMEM((tm, H), jnp.float32)]
        kernel = _mlp_itiled_kernel
        dims = ("parallel", "arbitrary")

    out = pl.pallas_call(
        kernel,
        out_shape=jax.ShapeDtypeStruct((M, H), x.dtype),
        grid_spec=pltpu.PrefetchScalarGridSpec(
            num_scalar_prefetch=0,
            grid=grid,
            in_specs=in_specs,
            out_specs=out_specs,
            scratch_shapes=scratch,
        ),
        compiler_params=pltpu.CompilerParams(
            dimension_semantics=dims,
            vmem_limit_bytes=vmem_limit,
        ),
        cost_estimate=cost,
    )(x2, w1, b1_2, w2, b2_2)

    return out.reshape(B, S, H)


def siglip_mlp(x, w1, b1, w2, b2, *, tm=512, ti=512, compute_dtype=None,
               force_itiled=False):
    """SiglipMLP forward.

    x:  (B, S, H) hidden_states
    w1: (H, I) = fc1.weight.T    b1: (I,) = fc1.bias
    w2: (I, H) = fc2.weight.T    b2: (H,) = fc2.bias
    compute_dtype: optionally cast x/W1/W2 (e.g. jnp.bfloat16) for full-rate MXU.
    """
    if compute_dtype is not None:
        x = x.astype(compute_dtype)
        w1 = w1.astype(compute_dtype)
        w2 = w2.astype(compute_dtype)

    B, S, H = x.shape
    I = w1.shape[1]
    M = B * S

    xsz = x.dtype.itemsize
    wsz = w1.dtype.itemsize

    # Row-tile alignment: 8 rows for f32, 16 for bf16 (sublane packing).
    row_align = 8 if xsz >= 4 else 8 * (4 // xsz)

    tm_eff = max(row_align, _round_up(min(tm, _round_up(M, row_align)), row_align))
    # v7x megacore: ensure >= 2 row tiles so both TensorCores get work.
    if pl.cdiv(M, tm_eff) == 1 and M > row_align:
        tm_eff = max(row_align, _round_up(pl.cdiv(M, 2), row_align))

    ti_eff = max(128, min(_round_up(ti, 128), _round_up(I, 128)))

    cap = _tpu_vmem_capacity_bytes()

    # Footprint of the fully-resident-weight layout: single-buffered weights,
    # double-buffered x / out tiles, f32 intermediate + its low-precision copy.
    resident_bytes = ((H * I + I * H + I + H) * wsz
                      + 4 * tm_eff * H * xsz
                      + tm_eff * I * (4 + wsz)
                      + (2 << 20))
    use_itiled = bool(force_itiled) or resident_bytes > (3 * cap) // 4

    if use_itiled:
        demand = (2 * (H * ti_eff + ti_eff * H + ti_eff + H) * wsz
                  + 4 * tm_eff * H * xsz
                  + tm_eff * H * 4
                  + tm_eff * ti_eff * (4 + wsz)
                  + (2 << 20))
    else:
        demand = resident_bytes

    # Demand-based VMEM limit (with slack), capped below physical capacity.
    vmem_limit = int(min(cap - cap // 10, 2 * demand + (8 << 20)))
    vmem_limit = max(vmem_limit, min(cap, 32 << 20))

    single_buffer = hasattr(pl, "Buffered")

    try:
        return _siglip_mlp_impl(x, w1, b1, w2, b2, tm=tm_eff, ti=ti_eff,
                                use_itiled=use_itiled,
                                single_buffer=single_buffer,
                                vmem_limit=vmem_limit)
    except Exception:
        if use_itiled:
            raise
        # Lower-VMEM fallback: stream weights over the intermediate dim with a
        # smaller row tile (never retry with a larger footprint).
        tm_fb = max(row_align, _round_up(max(tm_eff // 2, row_align), row_align))
        return _siglip_mlp_impl(x, w1, b1, w2, b2, tm=tm_fb, ti=ti_eff,
                                use_itiled=True,
                                single_buffer=single_buffer,
                                vmem_limit=vmem_limit)


# --------------------------- reference & tests -------------------------------

def _reference(x, w1, b1, w2, b2):
    x32 = x.astype(jnp.float32)
    h = jnp.einsum("bsh,hi->bsi", x32, w1.astype(jnp.float32)) + b1.astype(jnp.float32)
    h = _gelu_tanh(h)
    y = jnp.einsum("bsi,ih->bsh", h, w2.astype(jnp.float32)) + b2.astype(jnp.float32)
    return y  # f32


if __name__ == "__main__":
    key = jax.random.PRNGKey(0)
    k_x, k_w1, k_b1, k_w2, k_b2, k_x2 = jax.random.split(key, 6)

    # Small SigLIP-like config: hidden_size=128, intermediate_size=256.
    B, S, H, I = 2, 8, 128, 256
    x = jax.random.normal(k_x, (B, S, H), dtype=jnp.float32)
    # nn.Linear weights stored transposed as (in, out) for the kernel.
    w1 = jax.random.normal(k_w1, (H, I), dtype=jnp.float32) * 0.02
    b1 = jax.random.normal(k_b1, (I,), dtype=jnp.float32) * 0.02
    w2 = jax.random.normal(k_w2, (I, H), dtype=jnp.float32) * 0.02
    b2 = jax.random.normal(k_b2, (H,), dtype=jnp.float32) * 0.02

    # --- Test 1: f32, resident-weight path, strict tolerance ---
    y = siglip_mlp(x, w1, b1, w2, b2)
    jax.block_until_ready(y)
    y_ref = _reference(x, w1, b1, w2, b2)
    assert jnp.allclose(y.astype(jnp.float32), y_ref, atol=1e-4, rtol=1e-4), \
        "f32 mismatch vs reference"

    # --- Test 2: bf16 path, M=400 -> partial last row tile, grid > 1 ---
    B2, S2 = 2, 200
    xb = jax.random.normal(k_x2, (B2, S2, H), dtype=jnp.bfloat16)
    w1b, b1b = w1.astype(jnp.bfloat16), b1.astype(jnp.bfloat16)
    w2b, b2b = w2.astype(jnp.bfloat16), b2.astype(jnp.bfloat16)
    yb = siglip_mlp(xb, w1b, b1b, w2b, b2b)
    jax.block_until_ready(yb)
    yb_ref = _reference(xb, w1b, b1b, w2b, b2b)
    err = jnp.max(jnp.abs(yb.astype(jnp.float32) - yb_ref))
    assert float(err) < 1e-2, f"bf16 mismatch vs reference (max abs err {err})"

    # --- Test 3: forced I-tiled streaming path (v7x-style layout), I=320 not a
    # multiple of the 128-wide I tile -> exercises weight padding + accumulator.
    key3 = jax.random.PRNGKey(1)
    k_w1c, k_b1c, k_w2c, k_b2c = jax.random.split(key3, 4)
    I3 = 320
    w1c = jax.random.normal(k_w1c, (H, I3), dtype=jnp.float32) * 0.02
    b1c = jax.random.normal(k_b1c, (I3,), dtype=jnp.float32) * 0.02
    w2c = jax.random.normal(k_w2c, (I3, H), dtype=jnp.float32) * 0.02
    b2c = jax.random.normal(k_b2c, (H,), dtype=jnp.float32) * 0.02
    yc = siglip_mlp(x, w1c, b1c, w2c, b2c, ti=128, force_itiled=True)
    jax.block_until_ready(yc)
    yc_ref = _reference(x, w1c, b1c, w2c, b2c)
    assert jnp.allclose(yc.astype(jnp.float32), yc_ref, atol=5e-4, rtol=5e-4), \
        "I-tiled path mismatch vs reference"

    print("KERNEL_OK")
</pallas_src>

<mosaic_0001>
module attributes {stable_mosaic.version = 11 : i64} {
  func.func @_mlp_resident_kernel(%arg0: i32, %arg1: memref<8x128xf32, #tpu.memory_space<vmem>>, %arg2: memref<128x256xf32, #tpu.memory_space<vmem>>, %arg3: memref<1x256xf32, #tpu.memory_space<vmem>>, %arg4: memref<256x128xf32, #tpu.memory_space<vmem>>, %arg5: memref<1x128xf32, #tpu.memory_space<vmem>>, %arg6: memref<8x128xf32, #tpu.memory_space<vmem>>) attributes {dimension_semantics = [#tpu.dimension_semantics<parallel>], iteration_bounds = array<i64: 2>, scalar_prefetch = 0 : i64, scratch_operands = 0 : i64, tpu.core_type = #tpu.core_type<tc>, window_params = [{transform_indices = @transform_0, window_bounds = array<i64: 8, 128>}, {pipeline_mode = #tpu.pipeline_mode<synchronous>, transform_indices = @transform_1, window_bounds = array<i64: 128, 256>}, {pipeline_mode = #tpu.pipeline_mode<synchronous>, transform_indices = @transform_2, window_bounds = array<i64: 1, 256>}, {pipeline_mode = #tpu.pipeline_mode<synchronous>, transform_indices = @transform_3, window_bounds = array<i64: 256, 128>}, {pipeline_mode = #tpu.pipeline_mode<synchronous>, transform_indices = @transform_4, window_bounds = array<i64: 1, 128>}, {transform_indices = @transform_5, window_bounds = array<i64: 8, 128>}]} {
    %c0 = arith.constant 0 : index
    %c0_0 = arith.constant 0 : index
    %0 = vector.load %arg1[%c0, %c0_0] : memref<8x128xf32, #tpu.memory_space<vmem>>, vector<8x128xf32>
    %c0_1 = arith.constant 0 : index
    %c0_2 = arith.constant 0 : index
    %1 = vector.load %arg2[%c0_1, %c0_2] : memref<128x256xf32, #tpu.memory_space<vmem>>, vector<128x256xf32>
    %cst = arith.constant dense<0.000000e+00> : vector<8x256xf32>
    %2 = tpu.matmul %0, %1, %cst {dimension_numbers = #tpu.dot_dimension_numbers<[1], [0], [0], [1], [0, 0, 1, 1], [], []>} : vector<8x128xf32>, vector<128x256xf32>, vector<8x256xf32> -> vector<8x256xf32>
    %c0_3 = arith.constant 0 : index
    %c0_4 = arith.constant 0 : index
    %3 = vector.load %arg3[%c0_3, %c0_4] : memref<1x256xf32, #tpu.memory_space<vmem>>, vector<1x256xf32>
    %4 = vector.broadcast %3 : vector<1x256xf32> to vector<8x256xf32>
    %5 = arith.addf %2, %4 : vector<8x256xf32>
    %cst_5 = arith.constant 5.000000e-01 : f32
    %6 = vector.broadcast %cst_5 : f32 to vector<8x256xf32>
    %7 = arith.mulf %6, %5 : vector<8x256xf32>
    %cst_6 = arith.constant 4.471500e-02 : f32
    %8 = vector.broadcast %cst_6 : f32 to vector<8x256xf32>
    %9 = arith.mulf %8, %5 : vector<8x256xf32>
    %10 = arith.mulf %9, %5 : vector<8x256xf32>
    %11 = arith.mulf %10, %5 : vector<8x256xf32>
    %12 = arith.addf %5, %11 : vector<8x256xf32>
    %cst_7 = arith.constant 0.797884583 : f32
    %13 = vector.broadcast %cst_7 : f32 to vector<8x256xf32>
    %14 = arith.mulf %13, %12 : vector<8x256xf32>
    %15 = math.tanh %14 : vector<8x256xf32>
    %cst_8 = arith.constant 1.000000e+00 : f32
    %16 = vector.broadcast %cst_8 : f32 to vector<8x256xf32>
    %17 = arith.addf %16, %15 : vector<8x256xf32>
    %18 = arith.mulf %7, %17 : vector<8x256xf32>
    %c0_9 = arith.constant 0 : index
    %c0_10 = arith.constant 0 : index
    %19 = vector.load %arg4[%c0_9, %c0_10] : memref<256x128xf32, #tpu.memory_space<vmem>>, vector<256x128xf32>
    %cst_11 = arith.constant dense<0.000000e+00> : vector<8x128xf32>
    %20 = tpu.matmul %18, %19, %cst_11 {dimension_numbers = #tpu.dot_dimension_numbers<[1], [0], [0], [1], [0, 0, 1, 1], [], []>} : vector<8x256xf32>, vector<256x128xf32>, vector<8x128xf32> -> vector<8x128xf32>
    %c0_12 = arith.constant 0 : index
    %c0_13 = arith.constant 0 : index
    %21 = vector.load %arg5[%c0_12, %c0_13] : memref<1x128xf32, #tpu.memory_space<vmem>>, vector<1x128xf32>
    %22 = vector.broadcast %21 : vector<1x128xf32> to vector<8x128xf32>
    %23 = arith.addf %20, %22 : vector<8x128xf32>
    %c0_14 = arith.constant 0 : index
    %c0_15 = arith.constant 0 : index
    %24 = vector.load %arg6[%c0_14, %c0_15] : memref<8x128xf32, #tpu.memory_space<vmem>>, vector<8x128xf32>
    tpu.vector_store %arg6[%c0_14, %c0_15], %23 {strides = array<i32>} : memref<8x128xf32, #tpu.memory_space<vmem>>, vector<8x128xf32>,
    return
  }
  func.func @transform_0(%arg0: i32) -> (i32, i32) {
    %c0_i32 = arith.constant 0 : i32
    %c0_i32_0 = arith.constant 0 : i32
    return %arg0, %c0_i32 : i32, i32
  }
  func.func @transform_1(%arg0: i32) -> (i32, i32) {
    %c0_i32 = arith.constant 0 : i32
    %c0_i32_0 = arith.constant 0 : i32
    %c0_i32_1 = arith.constant 0 : i32
    return %c0_i32, %c0_i32_0 : i32, i32
  }
  func.func @transform_2(%arg0: i32) -> (i32, i32) {
    %c0_i32 = arith.constant 0 : i32
    %c0_i32_0 = arith.constant 0 : i32
    %c0_i32_1 = arith.constant 0 : i32
    return %c0_i32, %c0_i32_0 : i32, i32
  }
  func.func @transform_3(%arg0: i32) -> (i32, i32) {
    %c0_i32 = arith.constant 0 : i32
    %c0_i32_0 = arith.constant 0 : i32
    %c0_i32_1 = arith.constant 0 : i32
    return %c0_i32, %c0_i32_0 : i32, i32
  }
  func.func @transform_4(%arg0: i32) -> (i32, i32) {
    %c0_i32 = arith.constant 0 : i32
    %c0_i32_0 = arith.constant 0 : i32
    %c0_i32_1 = arith.constant 0 : i32
    return %c0_i32, %c0_i32_0 : i32, i32
  }
  func.func @transform_5(%arg0: i32) -> (i32, i32) {
    %c0_i32 = arith.constant 0 : i32
    %c0_i32_0 = arith.constant 0 : i32
    return %arg0, %c0_i32 : i32, i32
  }
}

module attributes {stable_mosaic.version = 11 : i64} {
  func.func @_mlp_itiled_kernel(%arg0: i32, %arg1: i32, %arg2: memref<8x128xf32, #tpu.memory_space<vmem>>, %arg3: memref<128x256xf32, #tpu.memory_space<vmem>>, %arg4: memref<1x256xf32, #tpu.memory_space<vmem>>, %arg5: memref<256x128xf32, #tpu.memory_space<vmem>>, %arg6: memref<1x128xf32, #tpu.memory_space<vmem>>, %arg7: memref<8x128xf32, #tpu.memory_space<vmem>>, %arg8: memref<8x128xf32, #tpu.memory_space<vmem>>) attributes {dimension_semantics = [#tpu.dimension_semantics<parallel>, #tpu.dimension_semantics<arbitrary>], iteration_bounds = array<i64: 2, 1>, scalar_prefetch = 0 : i64, scratch_operands = 1 : i64, tpu.core_type = #tpu.core_type<tc>, window_params = [{transform_indices = @transform_0, window_bounds = array<i64: 8, 128>}, {transform_indices = @transform_1, window_bounds = array<i64: 128, 256>}, {transform_indices = @transform_2, window_bounds = array<i64: 1, 256>}, {transform_indices = @transform_3, window_bounds = array<i64: 256, 128>}, {pipeline_mode = #tpu.pipeline_mode<synchronous>, transform_indices = @transform_4, window_bounds = array<i64: 1, 128>}, {transform_indices = @transform_5, window_bounds = array<i64: 8, 128>}]} {
    %c0_i32 = arith.constant 0 : i32
    %0 = arith.cmpi eq, %arg1, %c0_i32 : i32
    %1 = arith.extui %0 : i1 to i32
    %c0_i32_0 = arith.constant 0 : i32
    %2 = arith.cmpi ne, %1, %c0_i32_0 : i32
    scf.if %2 {
      %cst_19 = arith.constant 0.000000e+00 : f32
      %30 = vector.broadcast %cst_19 : f32 to vector<8x128xf32>
      %c0_20 = arith.constant 0 : index
      %c0_21 = arith.constant 0 : index
      %31 = vector.load %arg8[%c0_20, %c0_21] : memref<8x128xf32, #tpu.memory_space<vmem>>, vector<8x128xf32>
      tpu.vector_store %arg8[%c0_20, %c0_21], %30 {strides = array<i32>} : memref<8x128xf32, #tpu.memory_space<vmem>>, vector<8x128xf32>,
    } else {
    }
    %c0 = arith.constant 0 : index
    %c0_1 = arith.constant 0 : index
    %3 = vector.load %arg2[%c0, %c0_1] : memref<8x128xf32, #tpu.memory_space<vmem>>, vector<8x128xf32>
    %c0_2 = arith.constant 0 : index
    %c0_3 = arith.constant 0 : index
    %4 = vector.load %arg3[%c0_2, %c0_3] : memref<128x256xf32, #tpu.memory_space<vmem>>, vector<128x256xf32>
    %cst = arith.constant dense<0.000000e+00> : vector<8x256xf32>
    %5 = tpu.matmul %3, %4, %cst {dimension_numbers = #tpu.dot_dimension_numbers<[1], [0], [0], [1], [0, 0, 1, 1], [], []>} : vector<8x128xf32>, vector<128x256xf32>, vector<8x256xf32> -> vector<8x256xf32>
    %c0_4 = arith.constant 0 : index
    %c0_5 = arith.constant 0 : index
    %6 = vector.load %arg4[%c0_4, %c0_5] : memref<1x256xf32, #tpu.memory_space<vmem>>, vector<1x256xf32>
    %7 = vector.broadcast %6 : vector<1x256xf32> to vector<8x256xf32>
    %8 = arith.addf %5, %7 : vector<8x256xf32>
    %cst_6 = arith.constant 5.000000e-01 : f32
    %9 = vector.broadcast %cst_6 : f32 to vector<8x256xf32>
    %10 = arith.mulf %9, %8 : vector<8x256xf32>
    %cst_7 = arith.constant 4.471500e-02 : f32
    %11 = vector.broadcast %cst_7 : f32 to vector<8x256xf32>
    %12 = arith.mulf %11, %8 : vector<8x256xf32>
    %13 = arith.mulf %12, %8 : vector<8x256xf32>
    %14 = arith.mulf %13, %8 : vector<8x256xf32>
    %15 = arith.addf %8, %14 : vector<8x256xf32>
    %cst_8 = arith.constant 0.797884583 : f32
    %16 = vector.broadcast %cst_8 : f32 to vector<8x256xf32>
    %17 = arith.mulf %16, %15 : vector<8x256xf32>
    %18 = math.tanh %17 : vector<8x256xf32>
    %cst_9 = arith.constant 1.000000e+00 : f32
    %19 = vector.broadcast %cst_9 : f32 to vector<8x256xf32>
    %20 = arith.addf %19, %18 : vector<8x256xf32>
    %21 = arith.mulf %10, %20 : vector<8x256xf32>
    %c0_10 = arith.constant 0 : index
    %c0_11 = arith.constant 0 : index
    %22 = vector.load %arg8[%c0_10, %c0_11] : memref<8x128xf32, #tpu.memory_space<vmem>>, vector<8x128xf32>
    %c0_12 = arith.constant 0 : index
    %c0_13 = arith.constant 0 : index
    %23 = vector.load %arg5[%c0_12, %c0_13] : memref<256x128xf32, #tpu.memory_space<vmem>>, vector<256x128xf32>
    %cst_14 = arith.constant dense<0.000000e+00> : vector<8x128xf32>
    %24 = tpu.matmul %21, %23, %cst_14 {dimension_numbers = #tpu.dot_dimension_numbers<[1], [0], [0], [1], [0, 0, 1, 1], [], []>} : vector<8x256xf32>, vector<256x128xf32>, vector<8x128xf32> -> vector<8x128xf32>
    %25 = arith.addf %22, %24 : vector<8x128xf32>
    %c0_15 = arith.constant 0 : index
    %c0_16 = arith.constant 0 : index
    %26 = vector.load %arg8[%c0_15, %c0_16] : memref<8x128xf32, #tpu.memory_space<vmem>>, vector<8x128xf32>
    tpu.vector_store %arg8[%c0_15, %c0_16], %25 {strides = array<i32>} : memref<8x128xf32, #tpu.memory_space<vmem>>, vector<8x128xf32>,
    %c0_i32_17 = arith.constant 0 : i32
    %27 = arith.cmpi eq, %arg1, %c0_i32_17 : i32
    %28 = arith.extui %27 : i1 to i32
    %c0_i32_18 = arith.constant 0 : i32
    %29 = arith.cmpi ne, %28, %c0_i32_18 : i32
    scf.if %29 {
      %c0_19 = arith.constant 0 : index
      %c0_20 = arith.constant 0 : index
      %30 = vector.load %arg8[%c0_19, %c0_20] : memref<8x128xf32, #tpu.memory_space<vmem>>, vector<8x128xf32>
      %c0_21 = arith.constant 0 : index
      %c0_22 = arith.constant 0 : index
      %31 = vector.load %arg6[%c0_21, %c0_22] : memref<1x128xf32, #tpu.memory_space<vmem>>, vector<1x128xf32>
      %32 = vector.broadcast %31 : vector<1x128xf32> to vector<8x128xf32>
      %33 = arith.addf %30, %32 : vector<8x128xf32>
      %c0_23 = arith.constant 0 : index
      %c0_24 = arith.constant 0 : index
      %34 = vector.load %arg7[%c0_23, %c0_24] : memref<8x128xf32, #tpu.memory_space<vmem>>, vector<8x128xf32>
      tpu.vector_store %arg7[%c0_23, %c0_24], %33 {strides = array<i32>} : memref<8x128xf32, #tpu.memory_space<vmem>>, vector<8x128xf32>,
    } else {
    }
    return
  }
  func.func @transform_0(%arg0: i32, %arg1: i32) -> (i32, i32) {
    %c0_i32 = arith.constant 0 : i32
    %c0_i32_0 = arith.constant 0 : i32
    return %arg0, %c0_i32 : i32, i32
  }
  func.func @transform_1(%arg0: i32, %arg1: i32) -> (i32, i32) {
    %c0_i32 = arith.constant 0 : i32
    %c0_i32_0 = arith.constant 0 : i32
    return %c0_i32, %arg1 : i32, i32
  }
  func.func @transform_2(%arg0: i32, %arg1: i32) -> (i32, i32) {
    %c0_i32 = arith.constant 0 : i32
    %c0_i32_0 = arith.constant 0 : i32
    return %c0_i32, %arg1 : i32, i32
  }
  func.func @transform_3(%arg0: i32, %arg1: i32) -> (i32, i32) {
    %c0_i32 = arith.constant 0 : i32
    %c0_i32_0 = arith.constant 0 : i32
    return %arg1, %c0_i32 : i32, i32
  }
  func.func @transform_4(%arg0: i32, %arg1: i32) -> (i32, i32) {
    %c0_i32 = arith.constant 0 : i32
    %c0_i32_0 = arith.constant 0 : i32
    %c0_i32_1 = arith.constant 0 : i32
    return %c0_i32, %c0_i32_0 : i32, i32
  }
  func.func @transform_5(%arg0: i32, %arg1: i32) -> (i32, i32) {
    %c0_i32 = arith.constant 0 : i32
    %c0_i32_0 = arith.constant 0 : i32
    return %arg0, %c0_i32 : i32, i32
  }
}

</mosaic_0001>

<bundles_post_ra>
// kernel: _siglip_mlp_impl.1
= control target key start
LH: loop header
LB: loop body
LE: loop exit
PB: predicated region body
PF: predicated region fallthrough
CT: control target
= control target key end

     0   :  { %10 = vsyncpa [#allocation3], 0  ;;  %s1111_s0 = inlined_call_operand.hbm [shape: f32[16,128], index: 0, kind: input, shape index: {}]   ;;  %s1112_s1 = inlined_call_operand.hbm [shape: f32[128,256], index: 1, kind: input, shape index: {}]   ;;  %s1113_s2 = inlined_call_operand.vmem [shape: f32[1,256], index: 2, kind: input, shape index: {}]   ;;  %s1114_s3 = inlined_call_operand.hbm [shape: f32[256,128], index: 3, kind: input, shape index: {}]   ;;  %s1115_s4 = inlined_call_operand.vmem [shape: f32[1,128], index: 4, kind: input, shape index: {}]   ;;  %s1116_s5 = inlined_call_operand.hbm [shape: f32[16,128], index: 5, kind: output, shape index: {}]  }
   0x1   :  { %12 = vsyncpa [#allocation3 + $0x1], 0 }
   0x2   :  { %13 = vsyncpa [#allocation6], 0 }
   0x3   :  { %14 = vsyncpa [#allocation4], 0 }
   0x4   :  { %16 = vsyncpa [#allocation4 + $0x1], 0  ;;  %s933_s18 = smov 0   ;;  %s935_s19 = smov 0  }
   0x5   :  { %s937_s20 = smov 0   ;;  %s939_s21 = smov 0  }
   0x6 LB: > { %s954_s22 = sadd.s32 4294967295, %s892_s21   ;;  %s616_s23 = sadd.s32 4294967294, %s892_s21   ;;  %s892_s21 = sphi %s939_s21, %s1138_s21   ;;  %s888_s20 = sphi %s937_s20, %s1137_s20   ;;  %s884_s19 = sphi %s935_s19, %s1136_s19   ;;  %s880_s18 = sphi %s933_s18, %s1135_s18  }
   0x7   : > { %p42_p0 = scmp.ne.s32.totalorder %s884_s19, %s880_s18  ;;  %p1117_p1 = scmp.eq.s32.totalorder %s954_s22, 0 }
   0x8   : > { %p156_p3 = scmp.eq.s32.totalorder %s616_s23, 1  ;;  %p617_p5 = scmp.ge.s32.totalorder %s892_s21, 1 }
   0x9   : > { %p963_p4 = por %p1117_p1, %p42_p0  ;;  %p163_p7 = scmp.lt.s32.totalorder %s892_s21, 3 }
   0xa   : > { %p968_p6 = por %p156_p3, %p42_p0  ;;  %s894_s27 = smov [#allocation5]  }
   0xb   : > { %s1121_s24 = scalar_select %p963_p4, 1, 0 }
   0xc   : > { %s1122_s25 = scalar_select %p968_p6, 1, 0 }
   0xd   : > { %p973_p8 = pnand %p617_p5, %p163_p7  ;;  %s175_s28 = sshll.u32 %s894_s27, 4  ;;  %s176_s28 = int_to_ptr.vmem [resolvable:$true] %s175_s28 }
   0xe   : > { %s895_s30 = smov [#allocation7]   ;;  %s755_s7 = scalar_lea.vmem %s176_s28, 4096 }
   0xf   : > { %s1123_s26 = scalar_select %p973_p8, 1, 0 }
  0x10   : > { %p680_p9 = pneg %p973_p8  ;;  %s191_s6 = sshll.u32 %s895_s30, 4  ;;  %s192_s6 = int_to_ptr.vmem [resolvable:$true] %s191_s6 }
  0x11   : > { %p756_p13 = scmp.ne.s32.totalorder %s176_s28, %s755_s7  ;;  %p763_p5 = scmp.lt.s32.totalorder %s176_s28, %s176_s28 }
  0x12   : > { %p982_p11 = pnand %p680_p9, %p1117_p1  ;;  %p764_p7 = scmp.lt.s32.totalorder %s755_s7, %s755_s7 }
  0x14   : > { %p746_p12 = pneg %p982_p11  ;;  %p765_p10 = por %p764_p7, %p763_p5 }
  0x16   : > { %p758_p0 = pnand %p756_p13, %p746_p12 }
  0x18   : > { %p759_p3 = pneg %p758_p0 }
  0x1a   : > { %p766_p9 = pnand %p765_p10, %p759_p3 }
  0x1c   : > { %769 = shalt.err (!%p766_p9)
}
  0x1d   : > { %s896_s8 = smov 256   ;;  %s897_s9 = smov 16  }
  0x1e   : > { %683 = dma.hbm_to_vmem [thread:$0]  (!%p982_p11), %s1112_s1, 4096, %s176_s28, [#allocation6], %s896_s8, %s896_s8, %s897_s9  }
  0x1f   : > { %s781_s12 = scalar_lea.vmem %s192_s6, 4096  ;;  %p789_p2 = scmp.lt.s32.totalorder %s192_s6, %s192_s6 }
  0x20   : > { %p782_p1 = scmp.ne.s32.totalorder %s192_s6, %s781_s12  ;;  %p790_p6 = scmp.lt.s32.totalorder %s781_s12, %s781_s12 }
  0x22   : > { %p784_p13 = pnand %p782_p1, %p746_p12  ;;  %p791_p5 = por %p790_p6, %p789_p2 }
  0x24   : > { %p785_p0 = pneg %p784_p13 }
  0x26   : > { %p792_p10 = pnand %p791_p5, %p785_p0 }
  0x28   : > { %795 = shalt.err (!%p792_p10)
}
  0x29   : > { %s898_s13 = smov 128   ;;  %s899_s14 = smov 8  }
  0x2a   : > { %686 = dma.hbm_to_vmem [thread:$0]  (!%p982_p11), %s1114_s3, 4096, %s192_s6, [#allocation6], %s898_s13, %s898_s13, %s899_s14  }
  0x2b   : > { %s1005_s17 = sadd.s32 1, %s892_s21   ;;  %s29_s27 = sadd.s32 1, %s888_s20 }
  0x2c   : > { %s26_s23 = ssub.s32 %s892_s21, %s1005_s17  ;;  %p36_p2 = scmp.ne.s32.totalorder %s888_s20, %s884_s19 }
  0x2d   : > { %p27_p1 = scmp.eq.s32.totalorder %s26_s23, 0  ;;  %p37_p6 = scmp.eq.s32.totalorder %s892_s21, 0 }
  0x2e   : > { %p1125_p3 = scmp.eq.s32.totalorder %s954_s22, 1  ;;  %p697_p9 = scmp.lt.s32.totalorder %s892_s21, 2 }
  0x2f   : > { %s1014_s28 = scalar_select %p27_p1, %s888_s20, %s29_s27  }
  0x30   : > { %p38_p12 = por %p37_p6, %p36_p2  ;;  %p1018_p7 = por %p1125_p3, %p36_p2 }
  0x31   : > { %s208_s29 = sand.u32 1, %s888_s20   ;;  %s622_s6 = sshll.u32 %s892_s21, 7 }
  0x32   : > { %s1126_s30 = scalar_select %p1018_p7, 1, 0 }
  0x33   : > { %s621_s7 = sshll.u32 %s208_s29, 3  ;;  %s1028_s10 = scalar_lea.hbm %s1111_s0, %s622_s6 }
  0x34   : > { %s212_s11 = scalar_lea.vmem [#allocation2], %s621_s7  ;;  %p1030_p11 = pnand %p697_p9, %p38_p12 }
  0x35   : > { %s219_s12 = sshll.u32 %s212_s11, 4  ;;  %s209_s14 = scalar_lea.sflag [#allocation3], %s208_s29  ;;  %s220_s12 = int_to_ptr.vmem [resolvable:$true] %s219_s12 }
  0x36   : > { %s796_s15 = scalar_lea.hbm %s1028_s10, 128  ;;  %p798_p0 = pneg %p1030_p11 }
  0x37   : > { %p797_p13 = scmp.ne.s32.totalorder %s1028_s10, %s796_s15  ;;  %s801_s27 = scalar_lea.hbm %s1111_s0, 256 }
  0x38   : > { %p802_p1 = scmp.lt.s32.totalorder %s1028_s10, %s1111_s0  ;;  %p803_p2 = scmp.lt.s32.totalorder %s801_s27, %s796_s15 }
  0x39   : > { %p799_p5 = pnand %p798_p0, %p797_p13 }
  0x3a   : > { %p804_p6 = por %p803_p2, %p802_p1 }
  0x3b   : > { %p800_p10 = pneg %p799_p5 }
  0x3d   : > { %p805_p12 = pnand %p804_p6, %p800_p10 }
  0x3f   : > { %808 = shalt.err (!%p805_p12)
}
  0x40   : > { %s809_s8 = scalar_lea.vmem %s220_s12, 128  ;;  %s900_s29 = smov [#allocation2]  }
  0x41   : > { %p810_p3 = scmp.ne.s32.totalorder %s220_s12, %s809_s8  ;;  %s814_s9 = sshll.u32 %s900_s29, 4  ;;  %s815_s9 = int_to_ptr.vmem [resolvable:$false] %s814_s9 }
  0x42   : > { %s816_s11 = scalar_lea.vmem %s815_s9, 256  ;;  %p817_p13 = scmp.lt.s32.totalorder %s220_s12, %s815_s9 }
  0x43   : > { %p812_p9 = pnand %p810_p3, %p798_p0  ;;  %p818_p5 = scmp.lt.s32.totalorder %s816_s11, %s809_s8 }
  0x45   : > { %p813_p7 = pneg %p812_p9  ;;  %p819_p4 = por %p818_p5, %p817_p13 }
  0x47   : > { %p820_p8 = pnand %p819_p4, %p813_p7 }
  0x49   : > { %823 = shalt.err (!%p820_p8)
}
  0x4a   : > { %690 = dma.hbm_to_vmem [thread:$0]  (!%p1030_p11), %s1028_s10, 128, %s220_s12, %s209_s14  }
  0x4b   : > { %p1128_p10 = scmp.ne.s32.totalorder %s1123_s26, 0 }
  0x4c   : > { %s1051_s15 = sand.u32 (!%p1128_p10), 1, %s884_s19   ;;  %p1129_p4 = scmp.ne.s32.totalorder (!%p1128_p10), %s1121_s24, 0 }
  0x4d   : > { %228 = sbr.rel (%p1128_p10) target bundleno = 557 (0x22d), region = 40  ;;  %s624_s16 = sshll.u32 (!%p1128_p10), %s1051_s15, 3 }
  0x4e   : > { %s231_s23 = scalar_lea.sflag (!%p1128_p10), [#allocation3], %s1051_s15  ;;  %s1057_s27 = scalar_lea.vmem (!%p1128_p10), [#allocation2], %s624_s16 }
  0x52   : > { %867 = dma.done.wait (%p1129_p4), %s231_s23, 128  }
  0x53   : > { %869 = vsyncadd (%p1129_p4), %s231_s23, 4294967168  ;;  %p1130_p8 = scmp.eq.s32.totalorder %s954_s22, 0 }
  0x55   : > { %871 = dma.done.wait (%p1130_p8), [#allocation6], 8192   ;;  %p1131_p7 = pmov %p1130_p8 }
  0x56   : > { %v901_v0 = vmov 0.0   ;;  %v301_v1 = vld [vmem:[#allocation5 + $0xf8] sm:$0xff]  ;;  %v300_v2 = vld [vmem:[#allocation5 + $0xf0] sm:$0xff]  ;;  %v299_v3 = vld [vmem:[#allocation5 + $0xe8] sm:$0xff]  ;;  %s630_s13 = sshll.u32 %s954_s22, 7  ;;  %s268_s14 = scalar_lea.vmem [#allocation8], %s624_s16 }
  0x57   : > { %873 = vsyncadd (%p1131_p7), [#allocation6], 4294959104  ;;  %378 = vmatprep.mubr.f32.mxu0 %v901_v0  ;;  %314 = vmatprep.subr.mxu0 %v301_v1  ;;  %v298_v4 = vld [vmem:[#allocation5 + $0xe0] sm:$0xff]  ;;  %v297_v5 = vld [vmem:[#allocation5 + $0xd8] sm:$0xff]  ;;  %s527_s6 = sshll.u32 %s268_s14, 4  ;;  %s525_s29 = scalar_lea.hbm %s1116_s5, %s630_s13  ;;  %s528_s6 = int_to_ptr.vmem [resolvable:$true] %s527_s6 }
  0x58   : > { %315 = vmatpush1.msra.mxu0 %v300_v2  ;;  %v296_v6 = vld [vmem:[#allocation5 + $0xd0] sm:$0xff]  ;;  %v295_v7 = vld [vmem:[#allocation5 + $0xc8] sm:$0xff]  ;;  %v294_v8 = vld [vmem:[#allocation5 + $0xc0] sm:$0xff]  ;;  %v304_v2 = vlaneseq  ;;  %s514_s9 = scalar_lea.sflag [#allocation4], %s1051_s15  ;;  %s824_s11 = scalar_lea.vmem %s528_s6, 128 }
  0x59   : > { %316 = vmatprep.subr.mxu0 %v299_v3  ;;  %v293_v9 = vld [vmem:[#allocation5 + $0xb8] sm:$0xff]  ;;  %v292_v10 = vld [vmem:[#allocation5 + $0xb0] sm:$0xff]  ;;  %v291_v11 = vld [vmem:[#allocation5 + $0xa8] sm:$0xff]  ;;  %p825_p11 = scmp.ne.s32.totalorder %s528_s6, %s824_s11  ;;  %p1132_p0 = scmp.ne.s32.totalorder %s1126_s30, 0 }
  0x5a   : > { %317 = vmatpush1.msra.mxu0 %v298_v4  ;;  %v290_v12 = vld [vmem:[#allocation5 + $0xa0] sm:$0xff]  ;;  %v289_v13 = vld [vmem:[#allocation5 + $0x98] sm:$0xff]  ;;  %v288_v14 = vld [vmem:[#allocation5 + $0x90] sm:$0xff]  ;;  %v305_v3 = vshrl.u32 %v304_v2, 7  ;;  %s902_s23 = smov [#allocation8]  }
  0x5b   : > { %318 = vmatprep.subr.mxu0 %v297_v5  ;;  %v287_v15 = vld [vmem:[#allocation5 + $0x88] sm:$0xff]  ;;  %v286_v16 = vld [vmem:[#allocation5 + $0x80] sm:$0xff]  ;;  %v285_v17 = vld [vmem:[#allocation5 + $0x78] sm:$0xff]  ;;  %p826_p1 = pnand %p825_p11, %p1132_p0 }
  0x5c   : > { %319 = vmatpush1.msra.mxu0 %v296_v6  ;;  %v284_v18 = vld [vmem:[#allocation5 + $0x70] sm:$0xff]  ;;  %v283_v19 = vld [vmem:[#allocation5 + $0x68] sm:$0xff]  ;;  %v282_v20 = vld [vmem:[#allocation5 + $0x60] sm:$0xff]  ;;  %v306_v4 = vsub.s32 0, %v305_v3  ;;  %v310_v6 = vsub.s32 1, %v305_v3 }
  0x5d   : > { %320 = vmatprep.subr.mxu0 %v295_v7  ;;  %v281_v21 = vld [vmem:[#allocation5 + $0x58] sm:$0xff]  ;;  %v280_v22 = vld [vmem:[#allocation5 + $0x50] sm:$0xff]  ;;  %v279_v23 = vld [vmem:[#allocation5 + $0x48] sm:$0xff]  ;;  %p827_p2 = pneg %p826_p1 }
  0x5e   : > { %321 = vmatpush1.msra.mxu0 %v294_v8  ;;  %v278_v24 = vld [vmem:[#allocation5 + $0x40] sm:$0xff]  ;;  %v277_v25 = vld [vmem:[#allocation5 + $0x38] sm:$0xff]  ;;  %v276_v26 = vld [vmem:[#allocation5 + $0x30] sm:$0xff] }
  0x5f   : > { %322 = vmatprep.subr.mxu0 %v293_v9  ;;  %v275_v27 = vld [vmem:[#allocation5 + $0x28] sm:$0xff]  ;;  %v274_v28 = vld [vmem:[#allocation5 + $0x20] sm:$0xff]  ;;  %v273_v29 = vld [vmem:[#allocation5 + $0x18] sm:$0xff] }
  0x60   : > { %323 = vmatpush1.msra.mxu0 %v292_v10  ;;  %v272_v30 = vld [vmem:[#allocation5 + $0x10] sm:$0xff]  ;;  %v271_v31 = vld [vmem:[#allocation5 + $0x8] sm:$0xff]  ;;  %v270_v32 = vld [vmem:[#allocation5] sm:$0xff] }
  0x61   : > { %324 = vmatprep.subr.mxu0 %v291_v11  ;;  %v269_v33 = vld [vmem:[%s1057_s27] sm:$0xff]  ;;  %v432_v38 = vld [vmem:[#allocation7 + $0xe8] sm:$0xff]  ;;  %v431_v40 = vld [vmem:[#allocation7 + $0xe0] sm:$0xff]  ;;  %s828_s27 = sshll.u32 %s902_s23, 4  ;;  %s829_s27 = int_to_ptr.vmem [resolvable:$false] %s828_s27 }
  0x62   : > { %325 = vmatpush1.msra.mxu0 %v290_v12  ;;  %v434_v34 = vld [vmem:[#allocation7 + $0xf8] sm:$0xff]  ;;  %v433_v36 = vld [vmem:[#allocation7 + $0xf0] sm:$0xff]  ;;  %v416_v39 = vld [vmem:[#allocation7 + $0x68] sm:$0xff]  ;;  %s830_s22 = scalar_lea.vmem %s829_s27, 256  ;;  %p831_p6 = scmp.lt.s32.totalorder %s528_s6, %s829_s27 }
  0x63   : > { %326 = vmatprep.subr.mxu0 %v289_v13  ;;  %633 = vmatprep.subr.mxu1 %v434_v34  ;;  %v418_v35 = vld [vmem:[#allocation7 + $0x78] sm:$0xff]  ;;  %v417_v37 = vld [vmem:[#allocation7 + $0x70] sm:$0xff]  ;;  %v415_v41 = vld [vmem:[#allocation7 + $0x60] sm:$0xff]  ;;  %p832_p12 = scmp.lt.s32.totalorder %s830_s22, %s824_s11 }
  0x64   : > { %327 = vmatpush1.msra.mxu0 %v288_v14  ;;  %634 = vmatpush3.msra.mxu1 %v418_v35  ;;  %v430_v42 = vld [vmem:[#allocation7 + $0xd8] sm:$0xff]  ;;  %v429_v44 = vld [vmem:[#allocation7 + $0xd0] sm:$0xff]  ;;  %v428_v46 = vld [vmem:[#allocation7 + $0xc8] sm:$0xff] }
  0x65   : > { %328 = vmatprep.subr.mxu0 %v287_v15  ;;  %635 = vmatprep.subr.mxu1 %v433_v36  ;;  %v414_v43 = vld [vmem:[#allocation7 + $0x58] sm:$0xff]  ;;  %v413_v45 = vld [vmem:[#allocation7 + $0x50] sm:$0xff]  ;;  %v412_v47 = vld [vmem:[#allocation7 + $0x48] sm:$0xff]  ;;  %p833_p3 = por %p832_p12, %p831_p6 }
  0x66   : > { %329 = vmatpush1.msra.mxu0 %v286_v16  ;;  %636 = vmatpush3.msra.mxu1 %v417_v37  ;;  %v427_v48 = vld [vmem:[#allocation7 + $0xc0] sm:$0xff]  ;;  %v426_v50 = vld [vmem:[#allocation7 + $0xb8] sm:$0xff]  ;;  %v425_v52 = vld [vmem:[#allocation7 + $0xb0] sm:$0xff] }
  0x67   : > { %330 = vmatprep.subr.mxu0 %v285_v17  ;;  %637 = vmatprep.subr.mxu1 %v432_v38  ;;  %v411_v49 = vld [vmem:[#allocation7 + $0x40] sm:$0xff]  ;;  %v410_v51 = vld [vmem:[#allocation7 + $0x38] sm:$0xff]  ;;  %v409_v53 = vld [vmem:[#allocation7 + $0x30] sm:$0xff]  ;;  %p834_p9 = pnand %p833_p3, %p827_p2 }
  0x68   : > { %331 = vmatpush1.msra.mxu0 %v284_v18  ;;  %638 = vmatpush3.msra.mxu1 %v416_v39  ;;  %v424_v54 = vld [vmem:[#allocation7 + $0xa8] sm:$0xff]  ;;  %v423_v56 = vld [vmem:[#allocation7 + $0xa0] sm:$0xff]  ;;  %v422_v58 = vld [vmem:[#allocation7 + $0x98] sm:$0xff] }
  0x69   : > { %332 = vmatprep.subr.mxu0 %v283_v19  ;;  %639 = vmatprep.subr.mxu1 %v431_v40  ;;  %v408_v55 = vld [vmem:[#allocation7 + $0x28] sm:$0xff]  ;;  %v407_v57 = vld [vmem:[#allocation7 + $0x20] sm:$0xff]  ;;  %v406_v59 = vld [vmem:[#allocation7 + $0x18] sm:$0xff] }
  0x6a   : > { %333 = vmatpush1.msra.mxu0 %v282_v20  ;;  %640 = vmatpush3.msra.mxu1 %v415_v41  ;;  %v421_v60 = vld [vmem:[#allocation7 + $0x90] sm:$0xff]  ;;  %v420_v62 = vld [vmem:[#allocation7 + $0x88] sm:$0xff]  ;;  %v419_v0 = vld [vmem:[#allocation7 + $0x80] sm:$0xff] }
  0x6b   : > { %334 = vmatprep.subr.mxu0 %v281_v21  ;;  %641 = vmatprep.subr.mxu1 %v430_v42  ;;  %v405_v61 = vld [vmem:[#allocation7 + $0x10] sm:$0xff]  ;;  %v404_v63 = vld [vmem:[#allocation7 + $0x8] sm:$0xff]  ;;  %v403_v1 = vld [vmem:[#allocation7] sm:$0xff] }
  0x6c   : > { %335 = vmatpush1.msra.mxu0 %v280_v22  ;;  %642 = vmatpush3.msra.mxu1 %v414_v43  ;;  %v302_v5 = vld [vmem:[%s1113_s2] sm:$0x3] }
  0x6d   : > { %336 = vmatprep.subr.mxu0 %v279_v23  ;;  %643 = vmatprep.subr.mxu1 %v429_v44  ;;  %v307_v7 = vrot.slane %v302_v5, %v306_v4  ;;  %v311_v8 = vrot.slane %v302_v5, %v310_v6 }
  0x6e   : > { %337 = vmatpush1.msra.mxu0 %v278_v24  ;;  %644 = vmatpush3.msra.mxu1 %v413_v45 }
  0x6f   : > { %338 = vmatprep.subr.mxu0 %v277_v25  ;;  %645 = vmatprep.subr.mxu1 %v428_v46 }
  0x70   : > { %339 = vmatpush1.msra.mxu0 %v276_v26  ;;  %646 = vmatpush3.msra.mxu1 %v412_v47 }
  0x71   : > { %340 = vmatprep.subr.mxu0 %v275_v27  ;;  %647 = vmatprep.subr.mxu1 %v427_v48 }
  0x72   : > { %341 = vmatpush1.msra.mxu0 %v274_v28  ;;  %648 = vmatpush3.msra.mxu1 %v411_v49 }
  0x73   : > { %342 = vmatprep.subr.mxu0 %v273_v29  ;;  %649 = vmatprep.subr.mxu1 %v426_v50 }
  0x74   : > { %343 = vmatpush1.msra.mxu0 %v272_v30  ;;  %650 = vmatpush3.msra.mxu1 %v410_v51 }
  0x75   : > { %344 = vmatprep.subr.mxu0 %v271_v31  ;;  %651 = vmatprep.subr.mxu1 %v425_v52 }
  0x76   : > { %345 = vmatpush1.msra.mxu0 %v270_v32  ;;  %652 = vmatpush3.msra.mxu1 %v409_v53  ;;  %v628_v32 = vld [vmem:[%s1115_s4] ss:$0 sm:$0xff] }
  0x77   : > { %379 = vmatmul.mubr.f32.vlgmr.msra.gmra.mxu0 %v269_v33  ;;  %653 = vmatprep.subr.mxu1 %v424_v54 }
  0x78   : > { %654 = vmatpush3.msra.mxu1 %v408_v55 }
  0x79   : > { %655 = vmatprep.subr.mxu1 %v423_v56 }
  0x7a   : > { %656 = vmatpush3.msra.mxu1 %v407_v57 }
  0x7b   : > { %657 = vmatprep.subr.mxu1 %v422_v58 }
  0x7c   : > { %658 = vmatpush3.msra.mxu1 %v406_v59 }
  0x7d   : > { %659 = vmatprep.subr.mxu1 %v421_v60 }
  0x7e   : > { %660 = vmatpush3.msra.mxu1 %v405_v61 }
  0x7f   : > { %661 = vmatprep.subr.mxu1 %v420_v62 }
  0x80   : > { %662 = vmatpush3.msra.mxu1 %v404_v63 }
  0x81   : > { %663 = vmatprep.subr.mxu1 %v419_v0 }
  0x82   : > { %664 = vmatpush3.msra.mxu1 %v403_v1 }
 0x137   : > { %v380_v9 = vpop.f32.mrf.mxu0 }
 0x138   : > { %v381_v10 = vadd.f32 %v380_v9, %v307_v7 }
 0x139   : > { %v382_v11 = vpop.f32.mrf.mxu0 }
 0x13a   : > { %v387_v12 = vmul.f32 0.044715, %v381_v10  ;;  %v383_v13 = vadd.f32 %v382_v11, %v311_v8  ;;  %v385_v28 = vmul.f32 0.5, %v381_v10 }
 0x13c   : > { %v389_v14 = vmul.f32 %v387_v12, %v381_v10  ;;  %v388_v15 = vmul.f32 0.044715, %v383_v13  ;;  %v386_v26 = vmul.f32 0.5, %v383_v13 }
 0x13e   : > { %v390_v16 = vmul.f32 %v388_v15, %v383_v13  ;;  %v391_v17 = vmul.f32 %v389_v14, %v381_v10 }
 0x140   : > { %v392_v18 = vmul.f32 %v390_v16, %v383_v13  ;;  %v393_v19 = vadd.f32 %v391_v17, %v381_v10 }
 0x142   : > { %v394_v20 = vadd.f32 %v392_v18, %v383_v13  ;;  %v395_v21 = vmul.f32 0.7978846, %v393_v19 }
 0x144   : > { %v396_v22 = vmul.f32 0.7978846, %v394_v20  ;;  %740 = vtanh.f32 %v395_v21 }
 0x146   : > { %742 = vtanh.f32 %v396_v22 }
 0x151   : > { %v741_v23 = vpop.eup %740 }
 0x152   : > { %v399_v25 = vadd.f32 1.0, %v741_v23 }
 0x153   : > { %v743_v24 = vpop.eup %742 }
 0x154   : > { %v400_v27 = vadd.f32 1.0, %v743_v24  ;;  %v401_v30 = vmul.f32 %v399_v25, %v385_v28 }
 0x156   : > { %v402_v29 = vmul.f32 %v400_v27, %v386_v26 }
 0x158   : > { %506 = vmatprep.mubr.f32.mxu1 %v402_v29 }
 0x159   : > { %507 = vmatmul.mubr.f32.vlgmr.msra.gmra.mxu1 %v401_v30 }
 0x219   : > { %v665_v31 = vpop.f32.mrf.mxu1 }
 0x21b   : > { %v666_v33 = vpop.f32.mrf.mxu1 }
 0x21c   : > { %v667_v34 = vadd.f32 %v666_v33, %v665_v31 }
 0x21e   : > { %v509_v35 = vadd.f32 %v667_v34, %v628_v32 }
 0x220   : > { %512 = vst [vmem:[%s268_s14] sm:$0xff] %v509_v35 }
 0x221   : > { %837 = shalt.err (!%p834_p9)
}
 0x222   : > { %s838_s16 = scalar_lea.hbm %s525_s29, 128  ;;  %s842_s26 = scalar_lea.hbm %s1116_s5, 256 }
 0x223   : > { %p839_p13 = scmp.ne.s32.totalorder %s525_s29, %s838_s16  ;;  %p843_p4 = scmp.lt.s32.totalorder %s525_s29, %s1116_s5 }
 0x224   : > { %p844_p8 = scmp.lt.s32.totalorder %s842_s26, %s838_s16 }
 0x225   : > { %p840_p5 = pnand %p839_p13, %p1132_p0 }
 0x226   : > { %p845_p7 = por %p844_p8, %p843_p4 }
 0x227   : > { %p841_p10 = pneg %p840_p5 }
 0x229   : > { %p846_p11 = pnand %p845_p7, %p841_p10 }
 0x22b   : > { %849 = shalt.err (!%p846_p11)
}
 0x22c   : > { %678 = dma.vmem_to_hbm [thread:$0]  (%p1132_p0), %s528_s6, 128, %s525_s29, %s514_s9  }
 0x22d PF: > { %s539_s13 = sand.u32 1, %s880_s18   ;;  %p1133_p1 = scmp.ne.s32.totalorder %s1122_s25, 0 }
 0x22e   : > { %p1134_p2 = scmp.ge.s32.totalorder %s892_s21, 2  ;;  %s540_s14 = scalar_lea.sflag [#allocation4], %s539_s13 }
 0x230   : > { %p692_p6 = pnand %p1134_p2, %p1133_p1 }
 0x232   : > { %p693_p12 = pneg %p692_p6 }
 0x234   : > { %875 = dma.done.wait (%p693_p12), %s540_s14, 128  }
 0x235   : > { %877 = vsyncadd (%p693_p12), %s540_s14, 4294967168  ;;  %p19_p3 = scmp.ge.s32.totalorder %s1005_s17, 4   ;;  %s1135_s18 = smov %s884_s19 }
 0x236   : > { %s1136_s19 = smov %s888_s20  ;;  %s1137_s20 = smov %s1014_s28 }
 0x237   : > { %s1138_s21 = smov %s1005_s17  ;;  %21 = sbr.rel (!%p19_p3) target bundleno = 6 (0x6), region = 93 }
 0x23c   :  { %545 = vsyncpa [#allocation3], 1 }
 0x23d   :  { %547 = vsyncpa [#allocation3 + $0x1], 1 }
 0x23e   :  { %548 = vsyncpa [#allocation6], 1 }
 0x23f   :  { %549 = vsyncpa [#allocation4], 1 }
 0x240   :  { %551 = vsyncpa [#allocation4 + $0x1], 1 }

// kernel: _siglip_mlp_impl.1
= control target key start
LH: loop header
LB: loop body
LE: loop exit
PB: predicated region body
PF: predicated region fallthrough
CT: control target
= control target key end

     0   :  { %s1240_s0 = inlined_call_operand.hbm [shape: f32[16,128], index: 0, kind: input, shape index: {}]   ;;  %s1241_s1 = inlined_call_operand.hbm [shape: f32[128,256], index: 1, kind: input, shape index: {}]   ;;  %s1242_s2 = inlined_call_operand.vmem [shape: f32[1,256], index: 2, kind: input, shape index: {}]   ;;  %s1243_s3 = inlined_call_operand.hbm [shape: f32[256,128], index: 3, kind: input, shape index: {}]   ;;  %s1244_s4 = inlined_call_operand.vmem [shape: f32[1,128], index: 4, kind: input, shape index: {}]   ;;  %s1245_s5 = inlined_call_operand.hbm [shape: f32[16,128], index: 5, kind: output, shape index: {}]  }
   0x1   :  { %1249 = sst [smem:[#allocation13_spill]] %s1241_s1 }
   0x2   :  { %10 = vsyncpa [#allocation4], 0 }
   0x3   :  { %12 = vsyncpa [#allocation4 + $0x1], 0 }
   0x4   :  { %13 = vsyncpa [#allocation7], 0 }
   0x5   :  { %14 = vsyncpa [#allocation5], 0 }
   0x6   :  { %16 = vsyncpa [#allocation5 + $0x1], 0  ;;  %s1053_s18 = smov 0   ;;  %s1055_s19 = smov 0  }
   0x7   :  { %s1057_s20 = smov 0   ;;  %s1059_s21 = smov 0  }
   0x8   :  { %s1061_s22 = smov 0   ;;  %s1063_s23 = smov 0  }
   0x9 LB: > { %s702_s24 = sadd.s32 4294967295, %s1012_s23   ;;  %s703_s25 = sadd.s32 4294967294, %s1012_s23   ;;  %s1012_s23 = sphi %s1063_s23, %s22_s23   ;;  %s1008_s22 = sphi %s1061_s22, %s1267_s22   ;;  %s1004_s21 = sphi %s1059_s21, %s1266_s21   ;;  %s1000_s20 = sphi %s1057_s20, %s1265_s20   ;;  %s996_s19 = sphi %s1055_s19, %s1264_s19   ;;  %s992_s18 = sphi %s1053_s18, %s1263_s18  }
   0xa   : > { %p54_p0 = scmp.ne.s32.totalorder %s996_s19, %s992_s18  ;;  %p1087_p1 = scmp.eq.s32.totalorder %s702_s24, 0 }
   0xb   : > { %p1091_p2 = scmp.eq.s32.totalorder %s702_s24, 1  ;;  %p183_p3 = scmp.eq.s32.totalorder %s703_s25, 1 }
   0xc   : > { %s1250_s26 = scalar_select %p1087_p1, 1, 0 }
   0xd   : > { %p1097_p4 = por %p1087_p1, %p54_p0  ;;  %p704_p5 = scmp.ge.s32.totalorder %s1012_s23, 1 }
   0xe   : > { %p1102_p6 = por %p183_p3, %p54_p0  ;;  %p190_p7 = scmp.lt.s32.totalorder %s1012_s23, 3 }
   0xf   : > { %s1252_s28 = scalar_select %p1097_p4, 1, 0 }
  0x10   : > { %s1253_s29 = scalar_select %p1102_p6, 1, 0 }
  0x11   : > { %p1107_p8 = pnand %p704_p5, %p190_p7  ;;  %s1014_s6 = smov [#allocation6]  }
  0x12   : > { %s205_s7 = sshll.u32 %s1014_s6, 4  ;;  %s1015_s9 = smov [#allocation8]   ;;  %s206_s7 = int_to_ptr.vmem [resolvable:$true] %s205_s7 }
  0x13   : > { %p768_p9 = pneg %p1107_p8  ;;  %s229_s10 = sshll.u32 %s1015_s9, 4  ;;  %s230_s10 = int_to_ptr.vmem [resolvable:$true] %s229_s10 }
  0x14   : > { %s859_s11 = scalar_lea.vmem %s206_s7, 4096  ;;  %p867_p5 = scmp.lt.s32.totalorder %s206_s7, %s206_s7 }
  0x15   : > { %p1116_p11 = pnand %p768_p9, %p1087_p1  ;;  %p860_p13 = scmp.ne.s32.totalorder %s206_s7, %s859_s11 }
  0x16   : > { %p868_p7 = scmp.lt.s32.totalorder %s859_s11, %s859_s11 }
  0x17   : > { %p850_p12 = pneg %p1116_p11 }
  0x18   : > { %p869_p10 = por %p868_p7, %p867_p5 }
  0x19   : > { %p862_p0 = pnand %p860_p13, %p850_p12 }
  0x1b   : > { %p863_p3 = pneg %p862_p0 }
  0x1d   : > { %p870_p9 = pnand %p869_p10, %p863_p3 }
  0x1f   : > { %873 = shalt.err (!%p870_p9)
}
  0x20   : > { %s1016_s12 = smov 256   ;;  %s1017_s13 = smov 16  }
  0x21   : > { %s1256_s1 = sld [smem:[#allocation13_spill]]  ;;  %s885_s16 = scalar_lea.vmem %s230_s10, 4096 }
  0x22   : > { %p886_p6 = scmp.ne.s32.totalorder %s230_s10, %s885_s16  ;;  %p893_p1 = scmp.lt.s32.totalorder %s230_s10, %s230_s10 }
  0x23   : > { %p894_p4 = scmp.lt.s32.totalorder %s885_s16, %s885_s16 }
  0x24   : > { %p888_p13 = pnand %p886_p6, %p850_p12 }
  0x25   : > { %p895_p5 = por %p894_p4, %p893_p1 }
  0x26   : > { %p889_p0 = pneg %p888_p13 }
  0x27   : > { %771 = dma.hbm_to_vmem [thread:$0]  (!%p1116_p11), %s1256_s1, 4096, %s206_s7, [#allocation7], %s1016_s12, %s1016_s12, %s1017_s13  }
  0x28   : > { %p896_p10 = pnand %p895_p5, %p889_p0 }
  0x2a   : > { %899 = shalt.err (!%p896_p10)
}
  0x2b   : > { %s1018_s17 = smov 128   ;;  %s1019_s24 = smov 8  }
  0x2c   : > { %774 = dma.hbm_to_vmem [thread:$0]  (!%p1116_p11), %s1243_s3, 4096, %s230_s10, [#allocation7], %s1018_s17, %s1018_s17, %s1019_s24  }
  0x2d   : > { %s34_s7 = sadd.s32 1, %s1008_s22  ;;  %s41_s9 = sadd.s32 1, %s1000_s20 }
  0x2e   : > { %p36_p1 = scmp.ge.s32.totalorder %s34_s7, 2  ;;  %p48_p4 = scmp.ne.s32.totalorder %s1000_s20, %s996_s19 }
  0x2f   : > { %p49_p6 = scmp.eq.s32.totalorder %s1012_s23, 0  ;;  %p785_p12 = scmp.lt.s32.totalorder %s1012_s23, 2 }
  0x30   : > { %s1269_s7 = smov (%p36_p1, %s34_s7), 0  ;;  %p1148_p7 = por %p1091_p2, %p48_p4 }
  0x31   : > { %p50_p3 = por %p49_p6, %p48_p4  ;;  %s38_s8 = ssub.s32 %s1008_s22, %s1269_s7 }
  0x32   : > { %s246_s12 = sand.u32 1, %s1000_s20   ;;  %p39_p9 = scmp.eq.s32.totalorder %s38_s8, 0 }
  0x33   : > { %s709_s10 = sshll.u32 %s246_s12, 3  ;;  %s710_s13 = sshll.u32 %s1008_s22, 7 }
  0x34   : > { %s1157_s14 = scalar_select %p39_p9, %s1000_s20, %s41_s9  }
  0x35   : > { %s255_s17 = scalar_lea.hbm %s1240_s0, %s710_s13  ;;  %s250_s24 = scalar_lea.vmem [#allocation3], %s709_s10 }
  0x36   : > { %s257_s25 = sshll.u32 %s250_s24, 4  ;;  %p1164_p11 = pnand %p785_p12, %p50_p3  ;;  %s258_s25 = int_to_ptr.vmem [resolvable:$true] %s257_s25 }
  0x37   : > { %s247_s6 = scalar_lea.sflag [#allocation4], %s246_s12  ;;  %s913_s8 = scalar_lea.vmem %s258_s25, 128 }
  0x38   : > { %p902_p2 = pneg %p1164_p11  ;;  %p914_p13 = scmp.ne.s32.totalorder %s258_s25, %s913_s8 }
  0x39   : > { %s1020_s9 = smov [#allocation3]  }
  0x3a   : > { %p916_p0 = pnand %p914_p13, %p902_p2  ;;  %s918_s1 = sshll.u32 %s1020_s9, 4  ;;  %s919_s1 = int_to_ptr.vmem [resolvable:$false] %s918_s1 }
  0x3b   : > { %s920_s13 = scalar_lea.vmem %s919_s1, 256  ;;  %p921_p10 = scmp.lt.s32.totalorder %s258_s25, %s919_s1 }
  0x3c   : > { %p917_p5 = pneg %p916_p0  ;;  %p922_p1 = scmp.lt.s32.totalorder %s920_s13, %s913_s8 }
  0x3e   : > { %p923_p4 = por %p922_p1, %p921_p10 }
  0x40   : > { %p924_p6 = pnand %p923_p4, %p917_p5 }
  0x42   : > { %927 = shalt.err (!%p924_p6)
}
  0x43   : > { %778 = dma.hbm_to_vmem [thread:$0]  (!%p1164_p11), %s255_s17, 128, %s258_s25, %s247_s6  }
  0x44   : > { %266 = sbr.rel (%p1107_p8) target bundleno = 548 (0x224), region = 40  ;;  %s1175_s12 = sand.u32 (!%p1107_p8), 1, %s996_s19  }
  0x45   : > { %s712_s10 = sshll.u32 (!%p1107_p8), %s1175_s12, 3  ;;  %s269_s15 = scalar_lea.sflag (!%p1107_p8), [#allocation4], %s1175_s12 }
  0x46   : > { %s1181_s1 = scalar_lea.vmem (!%p1107_p8), [#allocation3], %s712_s10  ;;  %p1259_p12 = scmp.ne.s32.totalorder (!%p1107_p8), %s1252_s28, 0 }
  0x49   : > { %979 = dma.done.wait (%p1259_p12), %s269_s15, 128  }
  0x4a   : > { %981 = vsyncadd (%p1259_p12), %s269_s15, 4294967168  ;;  %p1260_p3 = scmp.ne.s32.totalorder %s1250_s26, 0 }
  0x4c   : > { %983 = dma.done.wait (%p1260_p3), [#allocation7], 8192  }
  0x4d   : > { %985 = vsyncadd (%p1260_p3), [#allocation7], 4294959104  ;;  %v1021_v0 = vmov 0.0   ;;  %v355_v1 = vld [vmem:[#allocation6 + $0xf8] sm:$0xff]  ;;  %v354_v2 = vld [vmem:[#allocation6 + $0xf0] sm:$0xff]  ;;  %s718_s17 = sshll.u32 %s1004_s21, 7 }
  0x4e   : > { %432 = vmatprep.mubr.f32.mxu0 %v1021_v0  ;;  %v353_v3 = vld [vmem:[#allocation6 + $0xe8] sm:$0xff]  ;;  %368 = vmatprep.subr.mxu0 %v355_v1  ;;  %v352_v4 = vld [vmem:[#allocation6 + $0xe0] sm:$0xff]  ;;  %v351_v5 = vld [vmem:[#allocation6 + $0xd8] sm:$0xff]  ;;  %s310_s24 = scalar_lea.vmem [#allocation9], %s712_s10  ;;  %s587_s8 = scalar_lea.hbm %s1245_s5, %s718_s17 }
  0x4f   : > { %369 = vmatpush1.msra.mxu0 %v354_v2  ;;  %v350_v6 = vld [vmem:[#allocation6 + $0xd0] sm:$0xff]  ;;  %v349_v7 = vld [vmem:[#allocation6 + $0xc8] sm:$0xff]  ;;  %v348_v8 = vld [vmem:[#allocation6 + $0xc0] sm:$0xff]  ;;  %v358_v2 = vlaneseq  ;;  %s589_s25 = sshll.u32 %s310_s24, 4  ;;  %s576_s9 = scalar_lea.sflag [#allocation5], %s1175_s12  ;;  %s590_s25 = int_to_ptr.vmem [resolvable:$true] %s589_s25 }
  0x50   : > { %370 = vmatprep.subr.mxu0 %v353_v3  ;;  %v347_v9 = vld [vmem:[#allocation6 + $0xb8] sm:$0xff]  ;;  %v346_v10 = vld [vmem:[#allocation6 + $0xb0] sm:$0xff]  ;;  %v345_v11 = vld [vmem:[#allocation6 + $0xa8] sm:$0xff]  ;;  %s928_s13 = scalar_lea.vmem %s590_s25, 128  ;;  %s1022_s15 = smov [#allocation9]  }
  0x51   : > { %371 = vmatpush1.msra.mxu0 %v352_v4  ;;  %v344_v12 = vld [vmem:[#allocation6 + $0xa0] sm:$0xff]  ;;  %v343_v13 = vld [vmem:[#allocation6 + $0x98] sm:$0xff]  ;;  %v342_v14 = vld [vmem:[#allocation6 + $0x90] sm:$0xff]  ;;  %v359_v3 = vshrl.u32 %v358_v2, 7  ;;  %p929_p8 = scmp.ne.s32.totalorder %s590_s25, %s928_s13 }
  0x52   : > { %372 = vmatprep.subr.mxu0 %v351_v5  ;;  %v341_v15 = vld [vmem:[#allocation6 + $0x88] sm:$0xff]  ;;  %v340_v16 = vld [vmem:[#allocation6 + $0x80] sm:$0xff]  ;;  %v339_v17 = vld [vmem:[#allocation6 + $0x78] sm:$0xff] }
  0x53   : > { %373 = vmatpush1.msra.mxu0 %v350_v6  ;;  %v338_v18 = vld [vmem:[#allocation6 + $0x70] sm:$0xff]  ;;  %v337_v19 = vld [vmem:[#allocation6 + $0x68] sm:$0xff]  ;;  %v336_v20 = vld [vmem:[#allocation6 + $0x60] sm:$0xff]  ;;  %v360_v4 = vsub.s32 0, %v359_v3  ;;  %v364_v6 = vsub.s32 1, %v359_v3  ;;  %p930_p9 = pnand %p929_p8, %p1148_p7 }
  0x54   : > { %374 = vmatprep.subr.mxu0 %v349_v7  ;;  %v335_v21 = vld [vmem:[#allocation6 + $0x58] sm:$0xff]  ;;  %v334_v22 = vld [vmem:[#allocation6 + $0x50] sm:$0xff]  ;;  %v333_v23 = vld [vmem:[#allocation6 + $0x48] sm:$0xff] }
  0x55   : > { %375 = vmatpush1.msra.mxu0 %v348_v8  ;;  %v332_v24 = vld [vmem:[#allocation6 + $0x40] sm:$0xff]  ;;  %v331_v25 = vld [vmem:[#allocation6 + $0x38] sm:$0xff]  ;;  %v330_v26 = vld [vmem:[#allocation6 + $0x30] sm:$0xff]  ;;  %p931_p11 = pneg %p930_p9 }
  0x56   : > { %376 = vmatprep.subr.mxu0 %v347_v9  ;;  %v329_v27 = vld [vmem:[#allocation6 + $0x28] sm:$0xff]  ;;  %v328_v28 = vld [vmem:[#allocation6 + $0x20] sm:$0xff]  ;;  %v327_v29 = vld [vmem:[#allocation6 + $0x18] sm:$0xff] }
  0x57   : > { %377 = vmatpush1.msra.mxu0 %v346_v10  ;;  %v326_v30 = vld [vmem:[#allocation6 + $0x10] sm:$0xff]  ;;  %v325_v31 = vld [vmem:[#allocation6 + $0x8] sm:$0xff]  ;;  %v324_v32 = vld [vmem:[#allocation6] sm:$0xff] }
  0x58   : > { %378 = vmatprep.subr.mxu0 %v345_v11  ;;  %v323_v33 = vld [vmem:[%s1181_s1] sm:$0xff]  ;;  %v487_v38 = vld [vmem:[#allocation8 + $0xe8] sm:$0xff]  ;;  %v486_v40 = vld [vmem:[#allocation8 + $0xe0] sm:$0xff]  ;;  %s932_s1 = sshll.u32 %s1022_s15, 4  ;;  %s933_s1 = int_to_ptr.vmem [resolvable:$false] %s932_s1 }
  0x59   : > { %379 = vmatpush1.msra.mxu0 %v344_v12  ;;  %v489_v34 = vld [vmem:[#allocation8 + $0xf8] sm:$0xff]  ;;  %v488_v36 = vld [vmem:[#allocation8 + $0xf0] sm:$0xff]  ;;  %v471_v39 = vld [vmem:[#allocation8 + $0x68] sm:$0xff]  ;;  %s934_s21 = scalar_lea.vmem %s933_s1, 256  ;;  %p935_p2 = scmp.lt.s32.totalorder %s590_s25, %s933_s1 }
  0x5a   : > { %380 = vmatprep.subr.mxu0 %v343_v13  ;;  %721 = vmatprep.subr.mxu1 %v489_v34  ;;  %v473_v35 = vld [vmem:[#allocation8 + $0x78] sm:$0xff]  ;;  %v472_v37 = vld [vmem:[#allocation8 + $0x70] sm:$0xff]  ;;  %v470_v41 = vld [vmem:[#allocation8 + $0x60] sm:$0xff]  ;;  %p936_p13 = scmp.lt.s32.totalorder %s934_s21, %s928_s13 }
  0x5b   : > { %381 = vmatpush1.msra.mxu0 %v342_v14  ;;  %722 = vmatpush3.msra.mxu1 %v473_v35  ;;  %v485_v42 = vld [vmem:[#allocation8 + $0xd8] sm:$0xff]  ;;  %v484_v44 = vld [vmem:[#allocation8 + $0xd0] sm:$0xff]  ;;  %v483_v46 = vld [vmem:[#allocation8 + $0xc8] sm:$0xff] }
  0x5c   : > { %382 = vmatprep.subr.mxu0 %v341_v15  ;;  %723 = vmatprep.subr.mxu1 %v488_v36  ;;  %v469_v43 = vld [vmem:[#allocation8 + $0x58] sm:$0xff]  ;;  %v468_v45 = vld [vmem:[#allocation8 + $0x50] sm:$0xff]  ;;  %v467_v47 = vld [vmem:[#allocation8 + $0x48] sm:$0xff]  ;;  %p937_p0 = por %p936_p13, %p935_p2 }
  0x5d   : > { %383 = vmatpush1.msra.mxu0 %v340_v16  ;;  %724 = vmatpush3.msra.mxu1 %v472_v37  ;;  %v482_v48 = vld [vmem:[#allocation8 + $0xc0] sm:$0xff]  ;;  %v481_v50 = vld [vmem:[#allocation8 + $0xb8] sm:$0xff]  ;;  %v480_v52 = vld [vmem:[#allocation8 + $0xb0] sm:$0xff] }
  0x5e   : > { %384 = vmatprep.subr.mxu0 %v339_v17  ;;  %725 = vmatprep.subr.mxu1 %v487_v38  ;;  %v466_v49 = vld [vmem:[#allocation8 + $0x40] sm:$0xff]  ;;  %v465_v51 = vld [vmem:[#allocation8 + $0x38] sm:$0xff]  ;;  %v464_v53 = vld [vmem:[#allocation8 + $0x30] sm:$0xff]  ;;  %p938_p5 = pnand %p937_p0, %p931_p11 }
  0x5f   : > { %385 = vmatpush1.msra.mxu0 %v338_v18  ;;  %726 = vmatpush3.msra.mxu1 %v471_v39  ;;  %v479_v54 = vld [vmem:[#allocation8 + $0xa8] sm:$0xff]  ;;  %v478_v56 = vld [vmem:[#allocation8 + $0xa0] sm:$0xff]  ;;  %v477_v58 = vld [vmem:[#allocation8 + $0x98] sm:$0xff] }
  0x60   : > { %386 = vmatprep.subr.mxu0 %v337_v19  ;;  %727 = vmatprep.subr.mxu1 %v486_v40  ;;  %v463_v55 = vld [vmem:[#allocation8 + $0x28] sm:$0xff]  ;;  %v462_v57 = vld [vmem:[#allocation8 + $0x20] sm:$0xff]  ;;  %v461_v59 = vld [vmem:[#allocation8 + $0x18] sm:$0xff] }
  0x61   : > { %387 = vmatpush1.msra.mxu0 %v336_v20  ;;  %728 = vmatpush3.msra.mxu1 %v470_v41  ;;  %v476_v60 = vld [vmem:[#allocation8 + $0x90] sm:$0xff]  ;;  %v475_v62 = vld [vmem:[#allocation8 + $0x88] sm:$0xff]  ;;  %v474_v0 = vld [vmem:[#allocation8 + $0x80] sm:$0xff] }
  0x62   : > { %388 = vmatprep.subr.mxu0 %v335_v21  ;;  %729 = vmatprep.subr.mxu1 %v485_v42  ;;  %v460_v61 = vld [vmem:[#allocation8 + $0x10] sm:$0xff]  ;;  %v459_v63 = vld [vmem:[#allocation8 + $0x8] sm:$0xff]  ;;  %v458_v1 = vld [vmem:[#allocation8] sm:$0xff] }
  0x63   : > { %389 = vmatpush1.msra.mxu0 %v334_v22  ;;  %730 = vmatpush3.msra.mxu1 %v469_v43  ;;  %v356_v5 = vld [vmem:[%s1242_s2] sm:$0x3] }
  0x64   : > { %390 = vmatprep.subr.mxu0 %v333_v23  ;;  %731 = vmatprep.subr.mxu1 %v484_v44  ;;  %v361_v7 = vrot.slane %v356_v5, %v360_v4  ;;  %v365_v8 = vrot.slane %v356_v5, %v364_v6 }
  0x65   : > { %391 = vmatpush1.msra.mxu0 %v332_v24  ;;  %732 = vmatpush3.msra.mxu1 %v468_v45 }
  0x66   : > { %392 = vmatprep.subr.mxu0 %v331_v25  ;;  %733 = vmatprep.subr.mxu1 %v483_v46 }
  0x67   : > { %393 = vmatpush1.msra.mxu0 %v330_v26  ;;  %734 = vmatpush3.msra.mxu1 %v467_v47 }
  0x68   : > { %394 = vmatprep.subr.mxu0 %v329_v27  ;;  %735 = vmatprep.subr.mxu1 %v482_v48 }
  0x69   : > { %395 = vmatpush1.msra.mxu0 %v328_v28  ;;  %736 = vmatpush3.msra.mxu1 %v466_v49 }
  0x6a   : > { %396 = vmatprep.subr.mxu0 %v327_v29  ;;  %737 = vmatprep.subr.mxu1 %v481_v50 }
  0x6b   : > { %397 = vmatpush1.msra.mxu0 %v326_v30  ;;  %738 = vmatpush3.msra.mxu1 %v465_v51 }
  0x6c   : > { %398 = vmatprep.subr.mxu0 %v325_v31  ;;  %739 = vmatprep.subr.mxu1 %v480_v52 }
  0x6d   : > { %399 = vmatpush1.msra.mxu0 %v324_v32  ;;  %740 = vmatpush3.msra.mxu1 %v464_v53 }
  0x6e   : > { %433 = vmatmul.mubr.f32.vlgmr.msra.gmra.mxu0 %v323_v33  ;;  %741 = vmatprep.subr.mxu1 %v479_v54  ;;  %v716_v33 = vld [vmem:[%s1244_s4] ss:$0 sm:$0xff] }
  0x6f   : > { %742 = vmatpush3.msra.mxu1 %v463_v55 }
  0x70   : > { %743 = vmatprep.subr.mxu1 %v478_v56 }
  0x71   : > { %744 = vmatpush3.msra.mxu1 %v462_v57 }
  0x72   : > { %745 = vmatprep.subr.mxu1 %v477_v58 }
  0x73   : > { %746 = vmatpush3.msra.mxu1 %v461_v59 }
  0x74   : > { %747 = vmatprep.subr.mxu1 %v476_v60 }
  0x75   : > { %748 = vmatpush3.msra.mxu1 %v460_v61 }
  0x76   : > { %749 = vmatprep.subr.mxu1 %v475_v62 }
  0x77   : > { %750 = vmatpush3.msra.mxu1 %v459_v63 }
  0x78   : > { %751 = vmatprep.subr.mxu1 %v474_v0 }
  0x79   : > { %752 = vmatpush3.msra.mxu1 %v458_v1 }
 0x12e   : > { %v434_v9 = vpop.f32.mrf.mxu0 }
 0x12f   : > { %v435_v10 = vadd.f32 %v434_v9, %v361_v7 }
 0x130   : > { %v436_v11 = vpop.f32.mrf.mxu0 }
 0x131   : > { %v441_v12 = vmul.f32 0.044715, %v435_v10  ;;  %v437_v13 = vadd.f32 %v436_v11, %v365_v8  ;;  %v439_v28 = vmul.f32 0.5, %v435_v10 }
 0x133   : > { %v443_v14 = vmul.f32 %v441_v12, %v435_v10  ;;  %v442_v15 = vmul.f32 0.044715, %v437_v13  ;;  %v440_v26 = vmul.f32 0.5, %v437_v13 }
 0x135   : > { %v444_v16 = vmul.f32 %v442_v15, %v437_v13  ;;  %v445_v17 = vmul.f32 %v443_v14, %v435_v10 }
 0x137   : > { %v446_v18 = vmul.f32 %v444_v16, %v437_v13  ;;  %v447_v19 = vadd.f32 %v445_v17, %v435_v10 }
 0x139   : > { %v448_v20 = vadd.f32 %v446_v18, %v437_v13  ;;  %v449_v21 = vmul.f32 0.7978846, %v447_v19 }
 0x13b   : > { %v450_v22 = vmul.f32 0.7978846, %v448_v20  ;;  %844 = vtanh.f32 %v449_v21 }
 0x13d   : > { %846 = vtanh.f32 %v450_v22 }
 0x148   : > { %v845_v23 = vpop.eup %844 }
 0x149   : > { %v453_v25 = vadd.f32 1.0, %v845_v23 }
 0x14a   : > { %v847_v24 = vpop.eup %846 }
 0x14b   : > { %v454_v27 = vadd.f32 1.0, %v847_v24  ;;  %v455_v30 = vmul.f32 %v453_v25, %v439_v28 }
 0x14d   : > { %v456_v29 = vmul.f32 %v454_v27, %v440_v26 }
 0x14f   : > { %554 = vmatprep.mubr.f32.mxu1 %v456_v29 }
 0x150   : > { %555 = vmatmul.mubr.f32.vlgmr.msra.gmra.mxu1 %v455_v30 }
 0x210   : > { %v753_v31 = vpop.f32.mrf.mxu1 }
 0x212   : > { %v754_v32 = vpop.f32.mrf.mxu1 }
 0x213   : > { %v755_v34 = vadd.f32 %v754_v32, %v753_v31 }
 0x215   : > { %v573_v35 = vadd.f32 %v755_v34, %v716_v33 }
 0x217   : > { %574 = vst [vmem:[%s310_s24] sm:$0xff] %v573_v35 }
 0x218   : > { %941 = shalt.err (!%p938_p5)
}
 0x219   : > { %s942_s10 = scalar_lea.hbm %s587_s8, 128  ;;  %s946_s28 = scalar_lea.hbm %s1245_s5, 256 }
 0x21a   : > { %p943_p10 = scmp.ne.s32.totalorder %s587_s8, %s942_s10  ;;  %p947_p6 = scmp.lt.s32.totalorder %s587_s8, %s1245_s5 }
 0x21b   : > { %p948_p12 = scmp.lt.s32.totalorder %s946_s28, %s942_s10 }
 0x21c   : > { %p944_p1 = pnand %p943_p10, %p1148_p7 }
 0x21d   : > { %p949_p3 = por %p948_p12, %p947_p6 }
 0x21e   : > { %p945_p4 = pneg %p944_p1 }
 0x220   : > { %p950_p8 = pnand %p949_p3, %p945_p4 }
 0x222   : > { %953 = shalt.err (!%p950_p8)
}
 0x223   : > { %766 = dma.vmem_to_hbm [thread:$0]  (%p1148_p7), %s590_s25, 128, %s587_s8, %s576_s9  }
 0x224 PF: > { %s601_s17 = sand.u32 1, %s992_s18   ;;  %p1261_p9 = scmp.ne.s32.totalorder %s1253_s29, 0 }
 0x225   : > { %p1262_p11 = scmp.ge.s32.totalorder %s1012_s23, 2  ;;  %s602_s24 = scalar_lea.sflag [#allocation5], %s601_s17 }
 0x227   : > { %p780_p2 = pnand %p1262_p11, %p1261_p9 }
 0x229   : > { %p781_p13 = pneg %p780_p2 }
 0x22b   : > { %987 = dma.done.wait (%p781_p13), %s602_s24, 128  }
 0x22c   : > { %989 = vsyncadd (%p781_p13), %s602_s24, 4294967168  ;;  %s22_s23 = sadd.s32 1, %s1012_s23   ;;  %s1263_s18 = smov %s996_s19 }
 0x22d   : > { %p19_p0 = scmp.ge.s32.totalorder %s22_s23, 4   ;;  %s1264_s19 = smov %s1000_s20 }
 0x22e   : > { %s1265_s20 = smov %s1157_s14  ;;  %s1266_s21 = smov %s1008_s22 }
 0x22f   : > { %s1267_s22 = smov %s1269_s7  ;;  %21 = sbr.rel (!%p19_p0) target bundleno = 9 (0x9), region = 106 }
 0x234   :  { %607 = vsyncpa [#allocation4], 1 }
 0x235   :  { %609 = vsyncpa [#allocation4 + $0x1], 1 }
 0x236   :  { %610 = vsyncpa [#allocation7], 1 }
 0x237   :  { %611 = vsyncpa [#allocation5], 1 }
 0x238   :  { %613 = vsyncpa [#allocation5 + $0x1], 1 }

</bundles_post_ra>
